<compile_context>
chip_gen: v7x
topology: tpu7x:2x2x1
jax: 0.10.0
libtpu: 0.0.40
codegen_flags: <defaults>
</compile_context>

<pallas_src>
import jax
import jax.numpy as jnp
from jax.experimental import pallas as pl
from jax.experimental.pallas import tpu as pltpu

EPS = 1e-5
NEG_SLOPE = 0.01  # torch.nn.LeakyReLU default negative_slope


def _leaky_relu(x):
    return jnp.where(x > 0, x, NEG_SLOPE * x)


def _round_up(a, b):
    return (a + b - 1) // b * b


def poincare_embed_kernel(
    x_ref,
    w1_ref, b1_ref, w2_ref, b2_ref, w3_ref, b3_ref,   # enc
    wnd_ref, bnd_ref,                                  # fused [norm | direction] head
    wp1_ref, bp1_ref, wp2_ref, bp2_ref, wp3_ref, bp3_ref,  # pred_head
    out_ref,                                           # (TM, n_poincare + 1)
):
    n_out = out_ref.shape[-1]
    n_poincare = n_out - 1

    x = x_ref[...]

    # --- enc: 3x (Linear -> LeakyReLU) ---
    h = _leaky_relu(jnp.dot(x, w1_ref[...], preferred_element_type=jnp.float32)
                    + b1_ref[...])
    h = _leaky_relu(jnp.dot(h, w2_ref[...], preferred_element_type=jnp.float32)
                    + b2_ref[...])
    h = _leaky_relu(jnp.dot(h, w3_ref[...], preferred_element_type=jnp.float32)
                    + b3_ref[...])

    # --- fused poincare_embed_norm + poincare_embed_direction ---
    # column 0 -> norm logit, columns 1.. -> direction
    nd = jnp.dot(h, wnd_ref[...], preferred_element_type=jnp.float32) + bnd_ref[...]
    norm = jax.nn.sigmoid(nd[:, 0:1])
    direction = nd[:, 1:]

    # embedding = direction / clamp(||direction||, min=eps) * norm
    # fold the two per-element ops into one broadcast multiply:
    ssq = jnp.sum(direction * direction, axis=-1, keepdims=True)
    dir_norm = jnp.maximum(jnp.sqrt(ssq), EPS)
    scale = norm / dir_norm                     # (TM, 1) narrow divide
    embedding = direction * scale

    # --- pred_head: Linear -> LeakyReLU -> Linear -> LeakyReLU -> Linear ---
    p = _leaky_relu(jnp.dot(embedding, wp1_ref[...],
                            preferred_element_type=jnp.float32) + bp1_ref[...])
    p = _leaky_relu(jnp.dot(p, wp2_ref[...],
                            preferred_element_type=jnp.float32) + bp2_ref[...])
    pred = (jnp.dot(p, wp3_ref[...], preferred_element_type=jnp.float32)
            + bp3_ref[...])

    # single merged narrow output: [embedding | pred]
    out_ref[...] = jnp.concatenate([embedding, pred], axis=-1)


def poincare_embed_forward(x, params, *, block_rows=1024):
    """x: (B, S, n_dim) float32.

    Returns (embedding (B, S, n_poincare), final_norm_pred (B, S, 1)).
    """
    B, S, n_dim = x.shape
    rows = B * S
    x2 = x.reshape(rows, n_dim)

    n_poincare = params["wd"].shape[1]
    n_out = n_poincare + 1

    # Row tile: multiple of 8 (f32 sublane), capped at block_rows and at a
    # VMEM guard (double-buffered x tile <= ~8 MiB), and the whole row extent
    # is padded to a multiple of the tile so the last block is never ragged.
    vmem_cap_rows = max(8, ((1 << 20) // max(n_dim, 1)) // 8 * 8)
    tm = min(block_rows, vmem_cap_rows)
    tm = max(8, _round_up(min(tm, _round_up(rows, 8)), 8))
    rows_p = _round_up(rows, tm)
    if rows_p != rows:
        x2 = jnp.pad(x2, ((0, rows_p - rows), (0, 0)))
    grid = (rows_p // tm,)

    # Fuse the 1-wide and n_poincare-wide projections into one matmul.
    wnd = jnp.concatenate([params["wn"], params["wd"]], axis=1)  # (n_hidden, 1+np)
    bnd = jnp.concatenate([params["bn"], params["bd"]], axis=1)  # (1, 1+np)

    args = (
        x2,
        params["w1"], params["b1"], params["w2"], params["b2"],
        params["w3"], params["b3"],
        wnd, bnd,
        params["wp1"], params["bp1"], params["wp2"], params["bp2"],
        params["wp3"], params["bp3"],
    )

    def const_spec(shape):
        # weights/biases: full-array block, constant index -> DMA'd once,
        # VMEM-resident across all grid steps.
        return pl.BlockSpec(shape, lambda i: (0,) * len(shape))

    in_specs = [pl.BlockSpec((tm, n_dim), lambda i: (i, 0))]
    in_specs += [const_spec(a.shape) for a in args[1:]]

    out_specs = pl.BlockSpec((tm, n_out), lambda i: (i, 0))
    out_shape = jax.ShapeDtypeStruct((rows_p, n_out), jnp.float32)

    out = pl.pallas_call(
        poincare_embed_kernel,
        grid=grid,
        in_specs=in_specs,
        out_specs=out_specs,
        out_shape=out_shape,
        compiler_params=pltpu.CompilerParams(
            dimension_semantics=("parallel",)),
    )(*args)

    out = out[:rows]
    emb = out[:, :n_poincare].reshape(B, S, n_poincare)
    pred = out[:, n_poincare:].reshape(B, S, 1)
    return emb, pred


def init_params(key, n_dim=128, n_hidden=32, n_poincare=2):
    """Deterministic init mimicking torch.nn.Linear's U(-1/sqrt(fan_in), +1/sqrt(fan_in))."""
    def linear(key, fan_in, fan_out):
        kw, kb = jax.random.split(key)
        bound = 1.0 / jnp.sqrt(fan_in)
        w = jax.random.uniform(kw, (fan_in, fan_out), jnp.float32, -bound, bound)
        b = jax.random.uniform(kb, (1, fan_out), jnp.float32, -bound, bound)
        return w, b

    keys = jax.random.split(key, 8)
    p = {}
    p["w1"], p["b1"] = linear(keys[0], n_dim, n_hidden)
    p["w2"], p["b2"] = linear(keys[1], n_hidden, n_hidden)
    p["w3"], p["b3"] = linear(keys[2], n_hidden, n_hidden)
    p["wn"], p["bn"] = linear(keys[3], n_hidden, 1)
    p["wd"], p["bd"] = linear(keys[4], n_hidden, n_poincare)
    p["wp1"], p["bp1"] = linear(keys[5], n_poincare, n_hidden)
    p["wp2"], p["bp2"] = linear(keys[6], n_hidden, n_hidden)
    p["wp3"], p["bp3"] = linear(keys[7], n_hidden, 1)
    return p


def reference_forward(x, params):
    """Pure-JAX reference (mirrors the PyTorch forward)."""
    h = _leaky_relu(x @ params["w1"] + params["b1"])
    h = _leaky_relu(h @ params["w2"] + params["b2"])
    h = _leaky_relu(h @ params["w3"] + params["b3"])
    norm = jax.nn.sigmoid(h @ params["wn"] + params["bn"])
    direction = h @ params["wd"] + params["bd"]
    dn = jnp.maximum(jnp.linalg.norm(direction, axis=-1, keepdims=True), EPS)
    emb = direction / dn * norm
    p = _leaky_relu(emb @ params["wp1"] + params["bp1"])
    p = _leaky_relu(p @ params["wp2"] + params["bp2"])
    pred = p @ params["wp3"] + params["bp3"]
    return emb, pred


if __name__ == "__main__":
    key = jax.random.PRNGKey(0)
    k_x, k_p = jax.random.split(key)

    B, S = 2, 8
    n_dim, n_hidden, n_poincare = 128, 32, 2

    x = jax.random.normal(k_x, (B, S, n_dim), dtype=jnp.float32)
    params = init_params(k_p, n_dim=n_dim, n_hidden=n_hidden,
                         n_poincare=n_poincare)

    emb, pred = poincare_embed_forward(x, params)
    emb = jax.block_until_ready(emb)
    pred = jax.block_until_ready(pred)

    # correctness check against pure-JAX reference
    emb_ref, pred_ref = reference_forward(x, params)
    assert emb.shape == (B, S, n_poincare) and pred.shape == (B, S, 1)
    assert jnp.allclose(emb, emb_ref, atol=1e-5, rtol=1e-5)
    assert jnp.allclose(pred, pred_ref, atol=1e-5, rtol=1e-5)

    print("KERNEL_OK")
</pallas_src>

<mosaic_0001>
module attributes {stable_mosaic.version = 11 : i64} {
  func.func @poincare_embed_kernel(%arg0: i32, %arg1: memref<16x128xf32, #tpu.memory_space<vmem>>, %arg2: memref<128x32xf32, #tpu.memory_space<vmem>>, %arg3: memref<1x32xf32, #tpu.memory_space<vmem>>, %arg4: memref<32x32xf32, #tpu.memory_space<vmem>>, %arg5: memref<1x32xf32, #tpu.memory_space<vmem>>, %arg6: memref<32x32xf32, #tpu.memory_space<vmem>>, %arg7: memref<1x32xf32, #tpu.memory_space<vmem>>, %arg8: memref<32x3xf32, #tpu.memory_space<vmem>>, %arg9: memref<1x3xf32, #tpu.memory_space<vmem>>, %arg10: memref<2x32xf32, #tpu.memory_space<vmem>>, %arg11: memref<1x32xf32, #tpu.memory_space<vmem>>, %arg12: memref<32x32xf32, #tpu.memory_space<vmem>>, %arg13: memref<1x32xf32, #tpu.memory_space<vmem>>, %arg14: memref<32x1xf32, #tpu.memory_space<vmem>>, %arg15: memref<1x1xf32, #tpu.memory_space<vmem>>, %arg16: memref<16x3xf32, #tpu.memory_space<vmem>>) attributes {dimension_semantics = [#tpu.dimension_semantics<parallel>], iteration_bounds = array<i64: 1>, scalar_prefetch = 0 : i64, scratch_operands = 0 : i64, tpu.core_type = #tpu.core_type<tc>, window_params = [{transform_indices = @transform_0, window_bounds = array<i64: 16, 128>}, {pipeline_mode = #tpu.pipeline_mode<synchronous>, transform_indices = @transform_1, window_bounds = array<i64: 128, 32>}, {pipeline_mode = #tpu.pipeline_mode<synchronous>, transform_indices = @transform_2, window_bounds = array<i64: 1, 32>}, {pipeline_mode = #tpu.pipeline_mode<synchronous>, transform_indices = @transform_3, window_bounds = array<i64: 32, 32>}, {pipeline_mode = #tpu.pipeline_mode<synchronous>, transform_indices = @transform_4, window_bounds = array<i64: 1, 32>}, {pipeline_mode = #tpu.pipeline_mode<synchronous>, transform_indices = @transform_5, window_bounds = array<i64: 32, 32>}, {pipeline_mode = #tpu.pipeline_mode<synchronous>, transform_indices = @transform_6, window_bounds = array<i64: 1, 32>}, {pipeline_mode = #tpu.pipeline_mode<synchronous>, transform_indices = @transform_7, window_bounds = array<i64: 32, 3>}, {pipeline_mode = #tpu.pipeline_mode<synchronous>, transform_indices = @transform_8, window_bounds = array<i64: 1, 3>}, {pipeline_mode = #tpu.pipeline_mode<synchronous>, transform_indices = @transform_9, window_bounds = array<i64: 2, 32>}, {pipeline_mode = #tpu.pipeline_mode<synchronous>, transform_indices = @transform_10, window_bounds = array<i64: 1, 32>}, {pipeline_mode = #tpu.pipeline_mode<synchronous>, transform_indices = @transform_11, window_bounds = array<i64: 32, 32>}, {pipeline_mode = #tpu.pipeline_mode<synchronous>, transform_indices = @transform_12, window_bounds = array<i64: 1, 32>}, {pipeline_mode = #tpu.pipeline_mode<synchronous>, transform_indices = @transform_13, window_bounds = array<i64: 32, 1>}, {pipeline_mode = #tpu.pipeline_mode<synchronous>, transform_indices = @transform_14, window_bounds = array<i64: 1, 1>}, {transform_indices = @transform_15, window_bounds = array<i64: 16, 3>}]} {
    %c0 = arith.constant 0 : index
    %c0_0 = arith.constant 0 : index
    %0 = vector.load %arg1[%c0, %c0_0] : memref<16x128xf32, #tpu.memory_space<vmem>>, vector<16x128xf32>
    %c0_1 = arith.constant 0 : index
    %c0_2 = arith.constant 0 : index
    %1 = vector.load %arg2[%c0_1, %c0_2] : memref<128x32xf32, #tpu.memory_space<vmem>>, vector<128x32xf32>
    %cst = arith.constant dense<0.000000e+00> : vector<16x32xf32>
    %2 = tpu.matmul %0, %1, %cst {dimension_numbers = #tpu.dot_dimension_numbers<[1], [0], [0], [1], [0, 0, 1, 1], [], []>} : vector<16x128xf32>, vector<128x32xf32>, vector<16x32xf32> -> vector<16x32xf32>
    %c0_3 = arith.constant 0 : index
    %c0_4 = arith.constant 0 : index
    %3 = vector.load %arg3[%c0_3, %c0_4] : memref<1x32xf32, #tpu.memory_space<vmem>>, vector<1x32xf32>
    %4 = vector.broadcast %3 : vector<1x32xf32> to vector<16x32xf32>
    %5 = arith.addf %2, %4 : vector<16x32xf32>
    %cst_5 = arith.constant 0.000000e+00 : f32
    %6 = vector.broadcast %cst_5 : f32 to vector<16x32xf32>
    %7 = arith.cmpf ogt, %5, %6 : vector<16x32xf32>
    %cst_6 = arith.constant 0.00999999977 : f32
    %8 = vector.broadcast %cst_6 : f32 to vector<16x32xf32>
    %9 = arith.mulf %8, %5 : vector<16x32xf32>
    %10 = arith.select %7, %5, %9 : vector<16x32xi1>, vector<16x32xf32>
    %c0_7 = arith.constant 0 : index
    %c0_8 = arith.constant 0 : index
    %11 = vector.load %arg4[%c0_7, %c0_8] : memref<32x32xf32, #tpu.memory_space<vmem>>, vector<32x32xf32>
    %cst_9 = arith.constant dense<0.000000e+00> : vector<16x32xf32>
    %12 = tpu.matmul %10, %11, %cst_9 {dimension_numbers = #tpu.dot_dimension_numbers<[1], [0], [0], [1], [0, 0, 1, 1], [], []>} : vector<16x32xf32>, vector<32x32xf32>, vector<16x32xf32> -> vector<16x32xf32>
    %c0_10 = arith.constant 0 : index
    %c0_11 = arith.constant 0 : index
    %13 = vector.load %arg5[%c0_10, %c0_11] : memref<1x32xf32, #tpu.memory_space<vmem>>, vector<1x32xf32>
    %14 = vector.broadcast %13 : vector<1x32xf32> to vector<16x32xf32>
    %15 = arith.addf %12, %14 : vector<16x32xf32>
    %cst_12 = arith.constant 0.000000e+00 : f32
    %16 = vector.broadcast %cst_12 : f32 to vector<16x32xf32>
    %17 = arith.cmpf ogt, %15, %16 : vector<16x32xf32>
    %cst_13 = arith.constant 0.00999999977 : f32
    %18 = vector.broadcast %cst_13 : f32 to vector<16x32xf32>
    %19 = arith.mulf %18, %15 : vector<16x32xf32>
    %20 = arith.select %17, %15, %19 : vector<16x32xi1>, vector<16x32xf32>
    %c0_14 = arith.constant 0 : index
    %c0_15 = arith.constant 0 : index
    %21 = vector.load %arg6[%c0_14, %c0_15] : memref<32x32xf32, #tpu.memory_space<vmem>>, vector<32x32xf32>
    %cst_16 = arith.constant dense<0.000000e+00> : vector<16x32xf32>
    %22 = tpu.matmul %20, %21, %cst_16 {dimension_numbers = #tpu.dot_dimension_numbers<[1], [0], [0], [1], [0, 0, 1, 1], [], []>} : vector<16x32xf32>, vector<32x32xf32>, vector<16x32xf32> -> vector<16x32xf32>
    %c0_17 = arith.constant 0 : index
    %c0_18 = arith.constant 0 : index
    %23 = vector.load %arg7[%c0_17, %c0_18] : memref<1x32xf32, #tpu.memory_space<vmem>>, vector<1x32xf32>
    %24 = vector.broadcast %23 : vector<1x32xf32> to vector<16x32xf32>
    %25 = arith.addf %22, %24 : vector<16x32xf32>
    %cst_19 = arith.constant 0.000000e+00 : f32
    %26 = vector.broadcast %cst_19 : f32 to vector<16x32xf32>
    %27 = arith.cmpf ogt, %25, %26 : vector<16x32xf32>
    %cst_20 = arith.constant 0.00999999977 : f32
    %28 = vector.broadcast %cst_20 : f32 to vector<16x32xf32>
    %29 = arith.mulf %28, %25 : vector<16x32xf32>
    %30 = arith.select %27, %25, %29 : vector<16x32xi1>, vector<16x32xf32>
    %c0_21 = arith.constant 0 : index
    %c0_22 = arith.constant 0 : index
    %31 = vector.load %arg8[%c0_21, %c0_22] : memref<32x3xf32, #tpu.memory_space<vmem>>, vector<32x3xf32>
    %cst_23 = arith.constant dense<0.000000e+00> : vector<16x3xf32>
    %32 = tpu.matmul %30, %31, %cst_23 {dimension_numbers = #tpu.dot_dimension_numbers<[1], [0], [0], [1], [0, 0, 1, 1], [], []>} : vector<16x32xf32>, vector<32x3xf32>, vector<16x3xf32> -> vector<16x3xf32>
    %c0_24 = arith.constant 0 : index
    %c0_25 = arith.constant 0 : index
    %33 = vector.load %arg9[%c0_24, %c0_25] : memref<1x3xf32, #tpu.memory_space<vmem>>, vector<1x3xf32>
    %34 = vector.broadcast %33 : vector<1x3xf32> to vector<16x3xf32>
    %35 = arith.addf %32, %34 : vector<16x3xf32>
    %36 = vector.extract_strided_slice %35 {offsets = [0, 0], sizes = [16, 1], strides = [1, 1]} : vector<16x3xf32> to vector<16x1xf32>
    %37 = arith.negf %36 : vector<16x1xf32>
    %38 = math.exp %37 : vector<16x1xf32>
    %cst_26 = arith.constant 1.000000e+00 : f32
    %39 = vector.broadcast %cst_26 : f32 to vector<16x1xf32>
    %40 = arith.addf %39, %38 : vector<16x1xf32>
    %41 = arith.divf %39, %40 : vector<16x1xf32>
    %42 = vector.extract_strided_slice %35 {offsets = [0, 1], sizes = [16, 2], strides = [1, 1]} : vector<16x3xf32> to vector<16x2xf32>
    %43 = arith.mulf %42, %42 : vector<16x2xf32>
    %cst_27 = arith.constant dense<0.000000e+00> : vector<16xf32>
    %44 = vector.multi_reduction <add>, %43, %cst_27 [1] : vector<16x2xf32> to vector<16xf32>
    %45 = vector.shape_cast %44 : vector<16xf32> to vector<16x1xf32>
    %46 = math.sqrt %45 : vector<16x1xf32>
    %cst_28 = arith.constant 9.99999974E-6 : f32
    %47 = vector.broadcast %cst_28 : f32 to vector<16x1xf32>
    %48 = arith.maximumf %46, %47 : vector<16x1xf32>
    %49 = arith.divf %41, %48 : vector<16x1xf32>
    %50 = vector.broadcast %49 : vector<16x1xf32> to vector<16x2xf32>
    %51 = arith.mulf %42, %50 : vector<16x2xf32>
    %c0_29 = arith.constant 0 : index
    %c0_30 = arith.constant 0 : index
    %52 = vector.load %arg10[%c0_29, %c0_30] : memref<2x32xf32, #tpu.memory_space<vmem>>, vector<2x32xf32>
    %cst_31 = arith.constant dense<0.000000e+00> : vector<16x32xf32>
    %53 = tpu.matmul %51, %52, %cst_31 {dimension_numbers = #tpu.dot_dimension_numbers<[1], [0], [0], [1], [0, 0, 1, 1], [], []>} : vector<16x2xf32>, vector<2x32xf32>, vector<16x32xf32> -> vector<16x32xf32>
    %c0_32 = arith.constant 0 : index
    %c0_33 = arith.constant 0 : index
    %54 = vector.load %arg11[%c0_32, %c0_33] : memref<1x32xf32, #tpu.memory_space<vmem>>, vector<1x32xf32>
    %55 = vector.broadcast %54 : vector<1x32xf32> to vector<16x32xf32>
    %56 = arith.addf %53, %55 : vector<16x32xf32>
    %cst_34 = arith.constant 0.000000e+00 : f32
    %57 = vector.broadcast %cst_34 : f32 to vector<16x32xf32>
    %58 = arith.cmpf ogt, %56, %57 : vector<16x32xf32>
    %cst_35 = arith.constant 0.00999999977 : f32
    %59 = vector.broadcast %cst_35 : f32 to vector<16x32xf32>
    %60 = arith.mulf %59, %56 : vector<16x32xf32>
    %61 = arith.select %58, %56, %60 : vector<16x32xi1>, vector<16x32xf32>
    %c0_36 = arith.constant 0 : index
    %c0_37 = arith.constant 0 : index
    %62 = vector.load %arg12[%c0_36, %c0_37] : memref<32x32xf32, #tpu.memory_space<vmem>>, vector<32x32xf32>
    %cst_38 = arith.constant dense<0.000000e+00> : vector<16x32xf32>
    %63 = tpu.matmul %61, %62, %cst_38 {dimension_numbers = #tpu.dot_dimension_numbers<[1], [0], [0], [1], [0, 0, 1, 1], [], []>} : vector<16x32xf32>, vector<32x32xf32>, vector<16x32xf32> -> vector<16x32xf32>
    %c0_39 = arith.constant 0 : index
    %c0_40 = arith.constant 0 : index
    %64 = vector.load %arg13[%c0_39, %c0_40] : memref<1x32xf32, #tpu.memory_space<vmem>>, vector<1x32xf32>
    %65 = vector.broadcast %64 : vector<1x32xf32> to vector<16x32xf32>
    %66 = arith.addf %63, %65 : vector<16x32xf32>
    %cst_41 = arith.constant 0.000000e+00 : f32
    %67 = vector.broadcast %cst_41 : f32 to vector<16x32xf32>
    %68 = arith.cmpf ogt, %66, %67 : vector<16x32xf32>
    %cst_42 = arith.constant 0.00999999977 : f32
    %69 = vector.broadcast %cst_42 : f32 to vector<16x32xf32>
    %70 = arith.mulf %69, %66 : vector<16x32xf32>
    %71 = arith.select %68, %66, %70 : vector<16x32xi1>, vector<16x32xf32>
    %c0_43 = arith.constant 0 : index
    %c0_44 = arith.constant 0 : index
    %72 = vector.load %arg14[%c0_43, %c0_44] : memref<32x1xf32, #tpu.memory_space<vmem>>, vector<32x1xf32>
    %cst_45 = arith.constant dense<0.000000e+00> : vector<16x1xf32>
    %73 = tpu.matmul %71, %72, %cst_45 {dimension_numbers = #tpu.dot_dimension_numbers<[1], [0], [0], [1], [0, 0, 1, 1], [], []>} : vector<16x32xf32>, vector<32x1xf32>, vector<16x1xf32> -> vector<16x1xf32>
    %c0_46 = arith.constant 0 : index
    %c0_47 = arith.constant 0 : index
    %74 = vector.load %arg15[%c0_46, %c0_47] : memref<1x1xf32, #tpu.memory_space<vmem>>, vector<1x1xf32>
    %75 = vector.broadcast %74 : vector<1x1xf32> to vector<16x1xf32>
    %76 = arith.addf %73, %75 : vector<16x1xf32>
    %77 = tpu.concatenate %51, %76 in 1 : vector<16x2xf32>, vector<16x1xf32> -> vector<16x3xf32>
    %c0_48 = arith.constant 0 : index
    %c0_49 = arith.constant 0 : index
    %78 = vector.load %arg16[%c0_48, %c0_49] : memref<16x3xf32, #tpu.memory_space<vmem>>, vector<16x3xf32>
    tpu.vector_store %arg16[%c0_48, %c0_49], %77 {strides = array<i32>} : memref<16x3xf32, #tpu.memory_space<vmem>>, vector<16x3xf32>,
    return
  }
  func.func @transform_0(%arg0: i32) -> (i32, i32) {
    %c0_i32 = arith.constant 0 : i32
    %c0_i32_0 = arith.constant 0 : i32
    return %arg0, %c0_i32 : i32, i32
  }
  func.func @transform_1(%arg0: i32) -> (i32, i32) {
    %c0_i32 = arith.constant 0 : i32
    %c0_i32_0 = arith.constant 0 : i32
    %c0_i32_1 = arith.constant 0 : i32
    return %c0_i32, %c0_i32_0 : i32, i32
  }
  func.func @transform_2(%arg0: i32) -> (i32, i32) {
    %c0_i32 = arith.constant 0 : i32
    %c0_i32_0 = arith.constant 0 : i32
    %c0_i32_1 = arith.constant 0 : i32
    return %c0_i32, %c0_i32_0 : i32, i32
  }
  func.func @transform_3(%arg0: i32) -> (i32, i32) {
    %c0_i32 = arith.constant 0 : i32
    %c0_i32_0 = arith.constant 0 : i32
    %c0_i32_1 = arith.constant 0 : i32
    return %c0_i32, %c0_i32_0 : i32, i32
  }
  func.func @transform_4(%arg0: i32) -> (i32, i32) {
    %c0_i32 = arith.constant 0 : i32
    %c0_i32_0 = arith.constant 0 : i32
    %c0_i32_1 = arith.constant 0 : i32
    return %c0_i32, %c0_i32_0 : i32, i32
  }
  func.func @transform_5(%arg0: i32) -> (i32, i32) {
    %c0_i32 = arith.constant 0 : i32
    %c0_i32_0 = arith.constant 0 : i32
    %c0_i32_1 = arith.constant 0 : i32
    return %c0_i32, %c0_i32_0 : i32, i32
  }
  func.func @transform_6(%arg0: i32) -> (i32, i32) {
    %c0_i32 = arith.constant 0 : i32
    %c0_i32_0 = arith.constant 0 : i32
    %c0_i32_1 = arith.constant 0 : i32
    return %c0_i32, %c0_i32_0 : i32, i32
  }
  func.func @transform_7(%arg0: i32) -> (i32, i32) {
    %c0_i32 = arith.constant 0 : i32
    %c0_i32_0 = arith.constant 0 : i32
    %c0_i32_1 = arith.constant 0 : i32
    return %c0_i32, %c0_i32_0 : i32, i32
  }
  func.func @transform_8(%arg0: i32) -> (i32, i32) {
    %c0_i32 = arith.constant 0 : i32
    %c0_i32_0 = arith.constant 0 : i32
    %c0_i32_1 = arith.constant 0 : i32
    return %c0_i32, %c0_i32_0 : i32, i32
  }
  func.func @transform_9(%arg0: i32) -> (i32, i32) {
    %c0_i32 = arith.constant 0 : i32
    %c0_i32_0 = arith.constant 0 : i32
    %c0_i32_1 = arith.constant 0 : i32
    return %c0_i32, %c0_i32_0 : i32, i32
  }
  func.func @transform_10(%arg0: i32) -> (i32, i32) {
    %c0_i32 = arith.constant 0 : i32
    %c0_i32_0 = arith.constant 0 : i32
    %c0_i32_1 = arith.constant 0 : i32
    return %c0_i32, %c0_i32_0 : i32, i32
  }
  func.func @transform_11(%arg0: i32) -> (i32, i32) {
    %c0_i32 = arith.constant 0 : i32
    %c0_i32_0 = arith.constant 0 : i32
    %c0_i32_1 = arith.constant 0 : i32
    return %c0_i32, %c0_i32_0 : i32, i32
  }
  func.func @transform_12(%arg0: i32) -> (i32, i32) {
    %c0_i32 = arith.constant 0 : i32
    %c0_i32_0 = arith.constant 0 : i32
    %c0_i32_1 = arith.constant 0 : i32
    return %c0_i32, %c0_i32_0 : i32, i32
  }
  func.func @transform_13(%arg0: i32) -> (i32, i32) {
    %c0_i32 = arith.constant 0 : i32
    %c0_i32_0 = arith.constant 0 : i32
    %c0_i32_1 = arith.constant 0 : i32
    return %c0_i32, %c0_i32_0 : i32, i32
  }
  func.func @transform_14(%arg0: i32) -> (i32, i32) {
    %c0_i32 = arith.constant 0 : i32
    %c0_i32_0 = arith.constant 0 : i32
    %c0_i32_1 = arith.constant 0 : i32
    return %c0_i32, %c0_i32_0 : i32, i32
  }
  func.func @transform_15(%arg0: i32) -> (i32, i32) {
    %c0_i32 = arith.constant 0 : i32
    %c0_i32_0 = arith.constant 0 : i32
    return %arg0, %c0_i32 : i32, i32
  }
}

</mosaic_0001>

<bundles_post_ra>
// kernel: tpu_custom_call.1
= control target key start
LH: loop header
LB: loop body
LE: loop exit
PB: predicated region body
PF: predicated region fallthrough
CT: control target
= control target key end

     0   :  { %vm169_vm2 = vcmask 261120   ;;  %vm469_vm7 = vcmask 15360   ;;  %vm526_vm12 = vcmask 1041408   ;;  %s1348_s1 = inlined_call_operand.vmem [shape: f32[128,32], index: 1, kind: input, shape index: {}]   ;;  %s1349_s0 = inlined_call_operand.vmem [shape: f32[16,128], index: 0, kind: input, shape index: {}]   ;;  %s1350_s3 = inlined_call_operand.vmem [shape: f32[32,32], index: 3, kind: input, shape index: {}]   ;;  %s1351_s2 = inlined_call_operand.vmem [shape: f32[1,32], index: 2, kind: input, shape index: {}]   ;;  %s1352_s5 = inlined_call_operand.vmem [shape: f32[32,32], index: 5, kind: input, shape index: {}]   ;;  %s1353_s4 = inlined_call_operand.vmem [shape: f32[1,32], index: 4, kind: input, shape index: {}]   ;;  %s1354_s7 = inlined_call_operand.vmem [shape: f32[32,3], index: 7, kind: input, shape index: {}]   ;;  %s1355_s6 = inlined_call_operand.vmem [shape: f32[1,32], index: 6, kind: input, shape index: {}]   ;;  %s1356_s8 = inlined_call_operand.vmem [shape: f32[1,3], index: 8, kind: input, shape index: {}]   ;;  %s1357_s9 = inlined_call_operand.vmem [shape: f32[2,32], index: 9, kind: input, shape index: {}]   ;;  %s1358_s11 = inlined_call_operand.vmem [shape: f32[32,32], index: 11, kind: input, shape index: {}]   ;;  %s1359_s10 = inlined_call_operand.vmem [shape: f32[1,32], index: 10, kind: input, shape index: {}]   ;;  %s1360_s13 = inlined_call_operand.vmem [shape: f32[32,1], index: 13, kind: input, shape index: {}]   ;;  %s1361_s14 = inlined_call_operand.<no memory space> [shape: f32[1,1], index: 14, kind: input, shape index: {}]   ;;  %s1362_s12 = inlined_call_operand.vmem [shape: f32[1,32], index: 12, kind: input, shape index: {}]   ;;  %s1363_s15 = inlined_call_operand.vmem [shape: f32[16,3], index: 15, kind: output, shape index: {}]  }
   0x1   :  { %v54_v0 = vld [vmem:[%s1348_s1] sm:$0xff]  ;;  %v55_v1 = vld [vmem:[%s1348_s1 + $0x8] sm:$0xff]  ;;  %v56_v2 = vld [vmem:[%s1348_s1 + $0x10] sm:$0xff] }
   0x2   :  { %v988_v3 = vpack.c.bf16 %v55_v1, %v54_v0  ;;  %v57_v4 = vld [vmem:[%s1348_s1 + $0x18] sm:$0xff]  ;;  %v58_v6 = vld [vmem:[%s1348_s1 + $0x20] sm:$0xff]  ;;  %v59_v7 = vld [vmem:[%s1348_s1 + $0x28] sm:$0xff] }
   0x3   :  { %v992_v5 = vpack.c.bf16 %v57_v4, %v56_v2  ;;  %v996_v8 = vpack.c.bf16 %v59_v7, %v58_v6  ;;  %v52_v9 = vld [vmem:[%s1349_s0] sm:$0xff]  ;;  %v60_v10 = vld [vmem:[%s1348_s1 + $0x30] sm:$0xff]  ;;  %v61_v11 = vld [vmem:[%s1348_s1 + $0x38] sm:$0xff] }
   0x4   :  { %989 = vmatprep.subr.bf16.mxu0 %v988_v3  ;;  %925 = vmatprep.mubr.f32.mxu0 %v52_v9  ;;  %v1000_v12 = vpack.c.bf16 %v61_v11, %v60_v10  ;;  %v62_v13 = vld [vmem:[%s1348_s1 + $0x40] sm:$0xff]  ;;  %v63_v14 = vld [vmem:[%s1348_s1 + $0x48] sm:$0xff]  ;;  %v64_v16 = vld [vmem:[%s1348_s1 + $0x50] sm:$0xff] }
   0x5   :  { %991 = vmatpush3.bf16.msra.mxu0 %v988_v3  ;;  %v1004_v15 = vpack.c.bf16 %v63_v14, %v62_v13  ;;  %v65_v17 = vld [vmem:[%s1348_s1 + $0x58] sm:$0xff]  ;;  %v66_v19 = vld [vmem:[%s1348_s1 + $0x60] sm:$0xff]  ;;  %v67_v20 = vld [vmem:[%s1348_s1 + $0x68] sm:$0xff] }
   0x6   :  { %993 = vmatprep.subr.bf16.mxu0 %v992_v5  ;;  %v1008_v18 = vpack.c.bf16 %v65_v17, %v64_v16  ;;  %v1012_v21 = vpack.c.bf16 %v67_v20, %v66_v19  ;;  %v68_v22 = vld [vmem:[%s1348_s1 + $0x70] sm:$0xff]  ;;  %v69_v23 = vld [vmem:[%s1348_s1 + $0x78] sm:$0xff]  ;;  %v53_v25 = vld [vmem:[%s1349_s0 + $0x8] sm:$0xff] }
   0x7   :  { %v1016_v24 = vpack.c.bf16 %v69_v23, %v68_v22  ;;  %v158_v26 = vld [vmem:[%s1350_s3] sm:$0xff]  ;;  %v159_v27 = vld [vmem:[%s1350_s3 + $0x8] sm:$0xff]  ;;  %v160_v29 = vld [vmem:[%s1350_s3 + $0x10] sm:$0xff] }
   0x8   :  { %v1020_v28 = vpack.c.bf16 %v159_v27, %v158_v26  ;;  %v161_v30 = vld [vmem:[%s1350_s3 + $0x18] sm:$0xff]  ;;  %v820_v32 = vld [vmem:[%s1351_s2] ss:$0 sm:$0xff]  ;;  %v258_v42 = vld [vmem:[%s1352_s5 + $0x8] sm:$0xff] }
   0x9   :  { %995 = vmatpush3.bf16.msra.mxu0 %v992_v5  ;;  %v1024_v31 = vpack.c.bf16 %v161_v30, %v160_v29  ;;  %v257_v41 = vld [vmem:[%s1352_s5] sm:$0xff]  ;;  %v259_v44 = vld [vmem:[%s1352_s5 + $0x10] sm:$0xff]  ;;  %v260_v45 = vld [vmem:[%s1352_s5 + $0x18] sm:$0xff] }
   0xa   :  { %997 = vmatprep.subr.bf16.mxu0 %v996_v8  ;;  %1021 = vmatprep.subr.bf16.mxu1 %v1020_v28  ;;  %v1028_v43 = vpack.c.bf16 %v258_v42, %v257_v41  ;;  %v1032_v46 = vpack.c.bf16 %v260_v45, %v259_v44  ;;  %v821_v47 = vld [vmem:[%s1353_s4] ss:$0 sm:$0xff]  ;;  %v356_v57 = vld [vmem:[%s1354_s7 + $0x8] sm:$0xff]  ;;  %v357_v59 = vld [vmem:[%s1354_s7 + $0x10] sm:$0xff] }
   0xb   :  { %1023 = vmatpush3.bf16.msra.mxu1 %v1020_v28  ;;  %v355_v56 = vld [vmem:[%s1354_s7] sm:$0xff]  ;;  %v358_v60 = vld [vmem:[%s1354_s7 + $0x18] sm:$0xff] }
   0xc   :  { %1025 = vmatprep.subr.bf16.mxu1 %v1024_v31  ;;  %v1036_v58 = vpack.c.bf16 %v356_v57, %v355_v56  ;;  %v1040_v61 = vpack.c.bf16 %v358_v60, %v357_v59  ;;  %v824_v62 = vld [vmem:[%s1355_s6] ss:$0 sm:$0xff]  ;;  %s1081_s6 = smov 127   ;;  %v614_v56 = vld [vmem:[%s1358_s11 + $0x18] sm:$0xff] }
   0xd   :  { %999 = vmatpush3.bf16.msra.mxu0 %v996_v8  ;;  %v827_v7 = vld [vmem:[%s1356_s8] ss:$0 sm:$0xff] }
   0xe   :  { %1001 = vmatprep.subr.bf16.mxu0 %v1000_v12  ;;  %v508_v45 = vld [vmem:[%s1357_s9] sm:$0x3] }
   0xf   :  { %1027 = vmatpush3.bf16.msra.mxu1 %v1024_v31 }
  0x10   :  { %1029 = vmatprep.subr.bf16.mxu1 %v1028_v43 }
  0x11   :  { %1003 = vmatpush3.bf16.msra.mxu0 %v1000_v12 }
  0x12   :  { %1005 = vmatprep.subr.bf16.mxu0 %v1004_v15 }
  0x15   :  { %1007 = vmatpush3.bf16.msra.mxu0 %v1004_v15 }
  0x16   :  { %1009 = vmatprep.subr.bf16.mxu0 %v1008_v18 }
  0x19   :  { %1011 = vmatpush3.bf16.msra.mxu0 %v1008_v18  ;;  %v1082_v18 = vmov 0  }
  0x1a   :  { %1013 = vmatprep.subr.bf16.mxu0 %v1012_v21  ;;  %1063 = vset.pattern.permute.xlu0 %v1082_v18 }
  0x1b   :  { %1064 = vset.pattern.permute.xlu1 %v1082_v18 }
  0x1d   :  { %1015 = vmatpush3.bf16.msra.mxu0 %v1012_v21 }
  0x1e   :  { %1017 = vmatprep.subr.bf16.mxu0 %v1016_v24 }
  0x21   :  { %1019 = vmatpush3.bf16.msra.mxu0 %v1016_v24 }
  0x24   :  { %926 = vmatmul.mubr.f32.vlgmr.msra.gmra.mrb[0].mxu0 %v53_v25 }
  0xf7   :  { %v927_v33 = vpop.f32.mrb[0].mxu0 }
  0xf8   :  { %v149_v34 = vadd.f32 %v927_v33, %v820_v32  ;;  %v143_v35 = vpop.f32.mrb[1].mxu0 }
  0xf9   :  { %v144_v36 = vadd.f32 %v820_v32, %v143_v35 }
  0xfa   :  { %v155_v37 = vmul.f32 0.01, %v149_v34  ;;  %vm153_vm0 = vcmp.gt.f32.partialorder %v149_v34, 0.0 }
  0xfb   :  { %vm152_vm1 = vcmp.gt.f32.partialorder %v144_v36, 0.0  ;;  %v154_v38 = vmul.f32 0.01, %v144_v36 }
  0xfc   :  { %v157_v40 = vsel %vm153_vm0, %v149_v34, %v155_v37 }
  0xfd   :  { %v156_v39 = vsel %vm152_vm1, %v144_v36, %v154_v38  ;;  %vm813_vm1 = vcmask 23552  }
  0xfe   :  { %936 = vmatprep.mubr.msk.f32.mxu1 %vm169_vm2, %v156_v39 }
  0xff   :  { %937 = vmatmul.mubr.msk.f32.vlgmr.msra.gmra.mrb[0].mxu1 %vm169_vm2, %v157_v40 }
 0x100   :  { %1031 = vmatpush3.bf16.msra.mxu1 %v1028_v43 }
 0x101   :  { %1033 = vmatprep.subr.bf16.mxu1 %v1032_v46 }
 0x104   :  { %1035 = vmatpush3.bf16.msra.mxu1 %v1032_v46 }
 0x105   :  { %1037 = vmatprep.subr.bf16.mxu1 %v1036_v58 }
 0x1d2   :  { %v938_v48 = vpop.f32.mrb[0].mxu1 }
 0x1d3   :  { %v248_v49 = vadd.f32 %v938_v48, %v821_v47  ;;  %v242_v50 = vpop.f32.mrb[1].mxu1 }
 0x1d4   :  { %v243_v51 = vadd.f32 %v821_v47, %v242_v50 }
 0x1d5   :  { %v254_v52 = vmul.f32 0.01, %v248_v49  ;;  %vm252_vm3 = vcmp.gt.f32.partialorder %v248_v49, 0.0 }
 0x1d6   :  { %vm251_vm4 = vcmp.gt.f32.partialorder %v243_v51, 0.0  ;;  %v253_v53 = vmul.f32 0.01, %v243_v51 }
 0x1d7   :  { %v256_v55 = vsel %vm252_vm3, %v248_v49, %v254_v52  ;;  %v611_v52 = vld [vmem:[%s1358_s11] sm:$0xff] }
 0x1d8   :  { %v255_v54 = vsel %vm251_vm4, %v243_v51, %v253_v53  ;;  %v612_v53 = vld [vmem:[%s1358_s11 + $0x8] sm:$0xff] }
 0x1d9   :  { %947 = vmatprep.mubr.msk.f32.mxu1 %vm169_vm2, %v255_v54  ;;  %v1044_v54 = vpack.c.bf16 %v612_v53, %v611_v52 }
 0x1da   :  { %948 = vmatmul.mubr.msk.f32.vlgmr.msra.gmra.mrb[2].mxu1 %vm169_vm2, %v256_v55  ;;  %v613_v55 = vld [vmem:[%s1358_s11 + $0x10] sm:$0xff] }
 0x1db   :  { %1039 = vmatpush3.bf16.msra.mxu1 %v1036_v58  ;;  %v1048_v57 = vpack.c.bf16 %v614_v56, %v613_v55  ;;  %v832_v58 = vld [vmem:[%s1359_s10] ss:$0 sm:$0xff] }
 0x1dc   :  { %1041 = vmatprep.subr.bf16.mxu1 %v1040_v61 }
 0x1df   :  { %1043 = vmatpush3.bf16.msra.mxu1 %v1040_v61 }
 0x1e0   :  { %961 = vmatprep.subr.msk.mxu1 %vm526_vm12, %v508_v45 }
 0x2ad   :  { %v949_v63 = vpop.f32.mrb[2].mxu1 }
 0x2ae   :  { %v346_v0 = vadd.f32 %v949_v63, %v824_v62  ;;  %v340_v1 = vpop.f32.mrb[3].mxu1 }
 0x2af   :  { %v341_v2 = vadd.f32 %v824_v62, %v340_v1 }
 0x2b0   :  { %v352_v3 = vmul.f32 0.01, %v346_v0  ;;  %vm350_vm5 = vcmp.gt.f32.partialorder %v346_v0, 0.0 }
 0x2b1   :  { %vm349_vm6 = vcmp.gt.f32.partialorder %v341_v2, 0.0  ;;  %v351_v4 = vmul.f32 0.01, %v341_v2 }
 0x2b2   :  { %v354_v6 = vsel %vm350_vm5, %v346_v0, %v352_v3  ;;  %v709_v3 = vld [vmem:[%s1360_s13] sm:$0xff] }
 0x2b3   :  { %v353_v5 = vsel %vm349_vm6, %v341_v2, %v351_v4  ;;  %v710_v4 = vld [vmem:[%s1360_s13 + $0x8] sm:$0xff] }
 0x2b4   :  { %958 = vmatprep.mubr.msk.f32.mxu1 %vm169_vm2, %v353_v5  ;;  %v1052_v5 = vpack.c.bf16 %v710_v4, %v709_v3 }
 0x2b5   :  { %959 = vmatmul.mubr.msk.f32.vlgmr.msra.gmra.mrb[4].mxu1 %vm169_vm2, %v354_v6  ;;  %v711_v6 = vld [vmem:[%s1360_s13 + $0x10] sm:$0xff] }
 0x2b6   :  { %962 = vmatpush3.msk.msra.mxu1 %vm526_vm12, %v508_v45  ;;  %1053 = vmatprep.subr.bf16.mxu0 %v1052_v5 }
 0x2b7   :  { %1045 = vmatprep.subr.bf16.mxu1 %v1044_v54  ;;  %1055 = vmatpush3.bf16.msra.mxu0 %v1052_v5 }
 0x388   :  { %v960_v8 = vpop.f32.mrb[4].mxu1 }
 0x389   :  { %v438_v9 = vpop.f32.mrb[5].mxu1  ;;  %v1274_v11 = vadd.f32 %v960_v8, %v827_v7 }
 0x38a   :  { %v1272_v10 = vadd.f32 %v827_v7, %v438_v9  ;;  %v712_v7 = vld [vmem:[%s1360_s13 + $0x18] sm:$0xff]  ;;  %v20_v9 = vstv %s1361_s14 }
 0x38b   :  { %v460_v13 = vmul.f32 %v1274_v11, %v1274_v11  ;;  %v831_v20 = vmul.f32 -1.442695, %v1274_v11  ;;  %v1056_v8 = vpack.c.bf16 %v712_v7, %v711_v6  ;;  %21 = vst [vmem:[#allocation2] sm:$0x1] %v20_v9 }
 0x38c   :  { %v459_v12 = vmul.f32 %v1272_v10, %v1272_v10  ;;  %v830_v19 = vmul.f32 -1.442695, %v1272_v10 }
 0x38d   :  { %1057 = vmatprep.subr.bf16.mxu0 %v1056_v8 }
 0x38e   :  { %463 = vrot.lane.b32.xlu0 %v459_v12, %s1081_s6  ;;  %1065 = vpow2.f32 %v830_v19  ;;  %1059 = vmatpush3.bf16.msra.mxu0 %v1056_v8 }
 0x392   :  { %465 = vrot.lane.b32.xlu0 %v460_v13, %s1081_s6  ;;  %v839_v19 = vld [vmem:[#allocation2] ss:$0 sm:$0xff] }
 0x398   :  { %v1066_v23 = vpop.eup %1065 }
 0x399   :  { %v453_v26 = vadd.f32 1.0, %v1066_v23 }
 0x400   :  { %v464_v14 = vpop.permute.xlu0 %463 }
 0x401   :  { %v470_v15 = vsel %vm469_vm7, %v464_v14, 0.0 }
 0x402   :  { %471 = vadd.xlane.f32.xlu1 %v470_v15 }
 0x404   :  { %v466_v16 = vpop.permute.xlu0 %465 }
 0x405   :  { %v473_v17 = vsel %vm469_vm7, %v466_v16, 0.0 }
 0x406   :  { %474 = vadd.xlane.f32.xlu1 %v473_v17 }
 0x48f   :  { %v472_v21 = vpop.xlane.xlu1 %471 }
 0x490   :  { %1067 = vrsqrt.f32 %v472_v21  ;;  %vm478_vm8 = vcmp.eq.f32.partialorder %v472_v21, inf  ;;  %v481_v27 = vand.u32 2147483648, %v472_v21  ;;  %vm480_vm9 = vcmp.eq.f32.partialorder %v472_v21, 0.0 }
 0x491   :  { %1069 = vpow2.f32 %v831_v20 }
 0x493   :  { %v475_v22 = vpop.xlane.xlu1 %474 }
 0x494   :  { %1071 = vrsqrt.f32 %v475_v22  ;;  %vm485_vm10 = vcmp.eq.f32.partialorder %v475_v22, inf  ;;  %v488_v35 = vand.u32 2147483648, %v475_v22  ;;  %vm487_vm11 = vcmp.eq.f32.partialorder %v475_v22, 0.0 }
 0x495   :  { %1073 = vrcp.f32 %v453_v26 }
 0x49a   :  { %v1068_v24 = vpop.eup %1067 }
 0x49b   :  { %v477_v25 = vmul.f32 %v1068_v24, %v472_v21  ;;  %v1070_v28 = vpop.eup %1069 }
 0x49c   :  { %v454_v34 = vadd.f32 1.0, %v1070_v28 }
 0x49d   :  { %v479_v29 = vsel %vm478_vm8, %v472_v21, %v477_v25 }
 0x49e   :  { %v1072_v30 = vpop.eup %1071  ;;  %v482_v31 = vsel %vm480_vm9, %v481_v27, %v479_v29 }
 0x49f   :  { %v490_v32 = vmax.f32 %v482_v31, 1e-05  ;;  %v484_v33 = vmul.f32 %v1072_v30, %v475_v22  ;;  %v1074_v39 = vpop.eup %1073 }
 0x4a1   :  { %1075 = vrcp.f32 %v490_v32  ;;  %v486_v36 = vsel %vm485_vm10, %v475_v22, %v484_v33 }
 0x4a2   :  { %v489_v37 = vsel %vm487_vm11, %v488_v35, %v486_v36  ;;  %1077 = vrcp.f32 %v454_v34 }
 0x4a3   :  { %v491_v38 = vmax.f32 %v489_v37, 1e-05 }
 0x4a5   :  { %1079 = vrcp.f32 %v491_v38 }
 0x4ab   :  { %v1076_v40 = vpop.eup %1075 }
 0x4ac   :  { %v493_v41 = vmul.f32 %v1076_v40, %v1074_v39  ;;  %v1078_v42 = vpop.eup %1077 }
 0x4ae   :  { %498 = vperm.xlu0 %1063, %v493_v41  }
 0x4af   :  { %v1080_v43 = vpop.eup %1079 }
 0x4b0   :  { %v495_v44 = vmul.f32 %v1080_v43, %v1078_v42 }
 0x4b2   :  { %503 = vperm.xlu1 %1064, %v495_v44  }
 0x52d   :  { %v499_v46 = vpop.permute.xlu0 %498 }
 0x52e   :  { %v506_v47 = vmul.f32 %v499_v46, %v1272_v10  ;;  %v836_v10 = vld [vmem:[%s1362_s12] ss:$0 sm:$0xff]  ;;  %s1083_s12 = smov 2  }
 0x530   :  { %518 = vrot.lane.b32.xlu0 %v506_v47, %s1081_s6 }
 0x531   :  { %v504_v48 = vpop.permute.xlu1 %503 }
 0x532   :  { %v507_v49 = vmul.f32 %v504_v48, %v1274_v11 }
 0x534   :  { %520 = vrot.lane.b32.xlu0 %v507_v49, %s1081_s6 }
 0x5a2   :  { %v1293_v50 = vpop.permute.xlu0 %518 }
 0x5a3   :  { %963 = vmatprep.mubr.msk.f32.mxu1 %vm469_vm7, %v1293_v50 }
 0x5a6   :  { %v1297_v51 = vpop.permute.xlu0 %520 }
 0x5a7   :  { %964 = vmatmul.mubr.msk.f32.vlgmr.msra.gmra.mrb[6].mxu1 %vm469_vm7, %v1297_v51 }
 0x5a8   :  { %1047 = vmatpush3.bf16.msra.mxu1 %v1044_v54 }
 0x5a9   :  { %1049 = vmatprep.subr.bf16.mxu1 %v1048_v57 }
 0x5ac   :  { %1051 = vmatpush3.bf16.msra.mxu1 %v1048_v57 }
 0x67a   :  { %v965_v59 = vpop.f32.mrb[6].mxu1 }
 0x67b   :  { %v602_v60 = vadd.f32 %v965_v59, %v832_v58  ;;  %v596_v61 = vpop.f32.mrb[7].mxu1 }
 0x67c   :  { %v597_v62 = vadd.f32 %v832_v58, %v596_v61 }
 0x67d   :  { %v608_v63 = vmul.f32 0.01, %v602_v60  ;;  %vm606_vm13 = vcmp.gt.f32.partialorder %v602_v60, 0.0 }
 0x67e   :  { %vm605_vm14 = vcmp.gt.f32.partialorder %v597_v62, 0.0  ;;  %v607_v0 = vmul.f32 0.01, %v597_v62 }
 0x67f   :  { %v610_v2 = vsel %vm606_vm13, %v602_v60, %v608_v63 }
 0x680   :  { %v609_v1 = vsel %vm605_vm14, %v597_v62, %v607_v0 }
 0x681   :  { %974 = vmatprep.mubr.msk.f32.mxu1 %vm169_vm2, %v609_v1 }
 0x682   :  { %975 = vmatmul.mubr.msk.f32.vlgmr.msra.gmra.mrb[8].mxu1 %vm169_vm2, %v610_v2 }
 0x755   :  { %v976_v11 = vpop.f32.mrb[8].mxu1 }
 0x756   :  { %v700_v12 = vadd.f32 %v976_v11, %v836_v10  ;;  %v694_v13 = vpop.f32.mrb[9].mxu1 }
 0x757   :  { %v695_v14 = vadd.f32 %v836_v10, %v694_v13 }
 0x758   :  { %v706_v15 = vmul.f32 0.01, %v700_v12  ;;  %vm704_vm15 = vcmp.gt.f32.partialorder %v700_v12, 0.0 }
 0x759   :  { %vm703_vm0 = vcmp.gt.f32.partialorder %v695_v14, 0.0  ;;  %v705_v16 = vmul.f32 0.01, %v695_v14 }
 0x75a   :  { %v708_v18 = vsel %vm704_vm15, %v700_v12, %v706_v15 }
 0x75b   :  { %v707_v17 = vsel %vm703_vm0, %v695_v14, %v705_v16 }
 0x75c   :  { %985 = vmatprep.mubr.msk.f32.mxu0 %vm169_vm2, %v707_v17 }
 0x75d   :  { %986 = vmatmul.mubr.msk.f32.vlgmr.msra.gmra.mrb[2].mxu0 %vm169_vm2, %v708_v18 }
 0x830   :  { %v987_v20 = vpop.f32.mrb[2].mxu0 }
 0x831   :  { %v798_v21 = vadd.f32 %v987_v20, %v839_v19  ;;  %v792_v22 = vpop.f32.mrb[3].mxu0 }
 0x832   :  { %v793_v23 = vadd.f32 %v839_v19, %v792_v22 }
 0x833   :  { %807 = vrot.lane.b32.xlu1 %v798_v21, %s1083_s12 }
 0x834   :  { %805 = vrot.lane.b32.xlu0 %v793_v23, %s1083_s12 }
 0x8a5   :  { %v808_v24 = vpop.permute.xlu1 %807 }
 0x8a6   :  { %v812_v25 = vsel %vm469_vm7, %v1297_v51, %v808_v24  ;;  %v806_v26 = vpop.permute.xlu0 %805 }
 0x8a7   :  { %815 = vst.msk [vmem:[%s1363_s15 + $0x8] sm:$0xff] %vm813_vm1, %v812_v25  ;;  %v811_v27 = vsel %vm469_vm7, %v1293_v50, %v806_v26 }
 0x8a8   :  { %814 = vst.msk [vmem:[%s1363_s15] sm:$0xff] %vm813_vm1, %v811_v27 }

</bundles_post_ra>
